<compile_context>
chip_gen: v7x
topology: tpu7x:2x2x1
jax: 0.10.0
libtpu: 0.0.40
codegen_flags: <defaults>
</compile_context>

<pallas_src>
import functools

import jax
import jax.numpy as jnp
from jax import lax
from jax.experimental import pallas as pl
from jax.experimental.pallas import tpu as pltpu

EPS = 1e-5  # nn.GroupNorm default eps


# ------------------------- Pallas kernel -------------------------

def _resblock_kernel(x_ref, w1_ref, b1_ref, g1_ref, be1_ref,
                     w2_ref, b2_ref, g2_ref, be2_ref,
                     wsc_ref, bsc_ref, gmat_ref, mask_ref,
                     out_ref, patch1_ref, patch2_ref,
                     *, width, n_groups, conv_shortcut):
    """Whole ResBlock for one image in channel-major (C, H*W) layout.

    x_ref   : (C_in, HW)  flattened NCHW image (pixels on the lane axis).
    w1/w2   : (C_out, 9*C) K-stacked bf16 conv weights, K ordered (kh, kw, c).
    wsc/bsc : (C_out, C_in) bf16 / (C_out, 1) f32 1x1-conv shortcut (dummy if unused).
    gmat    : (C_out, C_out) same-group indicator for the GroupNorm group reduce.
    mask    : (9, HW) 0/1 boundary masks, row t = kh*3+kw (zero-pad semantics).
    patch*  : VMEM scratch holding the im2col patch (9*C, HW) for each conv.
    """
    c_out, hw = out_ref.shape
    cg = c_out // n_groups
    cnt = jnp.float32(hw * cg)

    masks = mask_ref[...]                       # (9, HW) f32 boundary masks

    def build_patch(src, patch_ref):
        # im2col-in-VMEM: 9 lane-rolled (+masked) taps stacked along K (sublanes).
        c = src.shape[0]
        for kh in range(3):
            for kw in range(3):
                t = kh * 3 + kw
                d = (kh - 1) * width + (kw - 1)            # pixel offset of this tap
                tap = src if d == 0 else pltpu.roll(src, (-d) % hw, axis=1)
                if t != 4:                                  # center tap needs no mask
                    tap = tap * masks[t:t + 1, :]           # zero out-of-image pixels
                patch_ref[t * c:(t + 1) * c, :] = tap.astype(patch_ref.dtype)

    def conv3x3(patch_ref, w_ref, b_ref):
        # Single K-stacked MXU matmul, bf16 operands, f32 accumulation.
        return jnp.dot(w_ref[...], patch_ref[...].astype(jnp.bfloat16),
                       preferred_element_type=jnp.float32) + b_ref[...]

    def groupnorm_silu(y, gamma_ref, beta_ref):
        # Exact f32 lane reductions; tiny group-indicator matvec (default precision).
        ch_sum = jnp.sum(y, axis=1, keepdims=True)          # (C, 1)
        ch_sqs = jnp.sum(y * y, axis=1, keepdims=True)      # (C, 1)
        if cg == 1:
            gs, gss = ch_sum, ch_sqs
        else:
            g = gmat_ref[...]
            gs = jnp.dot(g, ch_sum, preferred_element_type=jnp.float32)
            gss = jnp.dot(g, ch_sqs, preferred_element_type=jnp.float32)
        mean = gs / cnt
        var = jnp.maximum(gss / cnt - mean * mean, 0.0)     # clamp E[x^2]-E[x]^2
        z = (y - mean) * lax.rsqrt(var + EPS) * gamma_ref[...] + beta_ref[...]
        return z * jax.nn.sigmoid(z)                        # SiLU

    xv = x_ref[...]                                         # (C_in, HW) f32

    # Block 1: conv3x3 -> GN -> SiLU
    build_patch(xv, patch1_ref)
    h1 = groupnorm_silu(conv3x3(patch1_ref, w1_ref, b1_ref), g1_ref, be1_ref)

    # Block 2: conv3x3 -> GN -> SiLU (h1 never leaves VMEM/registers)
    build_patch(h1, patch2_ref)
    z2 = groupnorm_silu(conv3x3(patch2_ref, w2_ref, b2_ref), g2_ref, be2_ref)

    # Fused shortcut (1x1 conv or identity) + residual add, single lane-dense store.
    if conv_shortcut:
        sc = jnp.dot(wsc_ref[...], xv.astype(jnp.bfloat16),
                     preferred_element_type=jnp.float32) + bsc_ref[...]
    else:
        sc = xv
    out_ref[...] = (z2 + sc).astype(out_ref.dtype)


# ------------------------- wrapper -------------------------

def _padded_bytes(shape, dtype):
    """(sublane,128)-padded VMEM footprint of one buffer of `shape`/`dtype`."""
    itemsize = jnp.dtype(dtype).itemsize
    sub_tile = 32 // itemsize                 # 8 rows f32, 16 rows bf16
    dims = (1, 1) + tuple(int(d) for d in shape)
    lead = 1
    for d in dims[:-2]:
        lead *= d
    rows = -(-dims[-2] // sub_tile) * sub_tile
    lanes = -(-dims[-1] // 128) * 128
    return lead * rows * lanes * itemsize


def _patch_dtype(c):
    # bf16 patch only when the per-tap row block stays (16,128)-tile aligned; tiny /
    # odd channel counts fall back to f32 (alignment-safe; VMEM is trivial there).
    return jnp.bfloat16 if c % 16 == 0 else jnp.float32


@functools.partial(jax.jit, static_argnames=("n_groups",))
def resblock_forward(x_nchw, params, *, n_groups):
    """ResBlock forward. x_nchw: (N, C_in, H, W) -> (N, C_out, H, W)."""
    n, c_in, h, w = x_nchw.shape
    c_out = params["w1"].shape[0]
    hw = h * w
    conv_shortcut = (c_in != c_out)
    assert c_out % n_groups == 0, "GroupNorm requires c_out % n_groups == 0"

    # NCHW is already channel-major: (N, C, H*W) is a free reshape (no HBM passes).
    x_flat = x_nchw.reshape(n, c_in, hw)

    # K-stacked conv weights (C_out, 9*C), K ordered (kh, kw, c); bf16 pre-cast.
    def stack_w(wt):
        o, i = wt.shape[0], wt.shape[1]
        return jnp.transpose(wt, (0, 2, 3, 1)).reshape(o, 9 * i).astype(jnp.bfloat16)

    w1s = stack_w(params["w1"])
    w2s = stack_w(params["w2"])
    if conv_shortcut:
        wsc = params["wsc"].reshape(c_out, c_in).astype(jnp.bfloat16)
        bsc = params["bsc"].reshape(c_out, 1).astype(jnp.float32)
    else:
        wsc = jnp.zeros((c_out, c_in), jnp.bfloat16)      # unused placeholders
        bsc = jnp.zeros((c_out, 1), jnp.float32)

    # Hoisted constants: lane-major per-tap boundary masks + group indicator matrix.
    pix = jnp.arange(hw)
    row, col = pix // w, pix % w
    ones = jnp.ones((hw,), bool)
    row_ok = [row > 0, ones, row < h - 1]
    col_ok = [col > 0, ones, col < w - 1]
    masks = jnp.stack([(row_ok[kh] & col_ok[kw]).astype(jnp.float32)
                       for kh in range(3) for kw in range(3)])            # (9, HW)
    cg = c_out // n_groups
    cid = jnp.arange(c_out)
    gmat = (cid[:, None] // cg == cid[None, :] // cg).astype(jnp.float32)  # (C, C)

    vec = lambda v: v.reshape(c_out, 1).astype(jnp.float32)

    p1_dt, p2_dt = _patch_dtype(c_in), _patch_dtype(c_out)

    # VMEM budget from padded footprints x actual buffer counts (2 for pipelined I/O,
    # 1 for scratch), capped against the device's real VMEM capacity.
    io_blocks = [
        ((c_in, hw), jnp.float32), ((c_out, 9 * c_in), jnp.bfloat16),
        ((c_out, 1), jnp.float32), ((c_out, 1), jnp.float32), ((c_out, 1), jnp.float32),
        ((c_out, 9 * c_out), jnp.bfloat16),
        ((c_out, 1), jnp.float32), ((c_out, 1), jnp.float32), ((c_out, 1), jnp.float32),
        ((c_out, c_in), jnp.bfloat16), ((c_out, 1), jnp.float32),
        ((c_out, c_out), jnp.float32), ((9, hw), jnp.float32),
        ((c_out, hw), jnp.float32),                          # output block
    ]
    footprint = sum(2 * _padded_bytes(s, d) for s, d in io_blocks)
    footprint += _padded_bytes((9 * c_in, hw), p1_dt) + _padded_bytes((9 * c_out, hw), p2_dt)
    try:
        vmem_cap = int(pltpu.get_tpu_info().vmem_capacity_bytes)
    except Exception:
        vmem_cap = 64 << 20                                  # v7x per-core (smallest)
    vmem_limit = int(min(max(2 * footprint, 32 << 20), int(0.9 * vmem_cap)))

    kernel = functools.partial(_resblock_kernel, width=w, n_groups=n_groups,
                               conv_shortcut=conv_shortcut)

    out_flat = pl.pallas_call(
        kernel,
        out_shape=jax.ShapeDtypeStruct((n, c_out, hw), jnp.float32),
        grid=(n,),
        in_specs=[
            pl.BlockSpec((None, c_in, hw), lambda i: (i, 0, 0)),   # x (per image)
            pl.BlockSpec((c_out, 9 * c_in), lambda i: (0, 0)),     # w1 stacked bf16
            pl.BlockSpec((c_out, 1), lambda i: (0, 0)),            # b1
            pl.BlockSpec((c_out, 1), lambda i: (0, 0)),            # g1
            pl.BlockSpec((c_out, 1), lambda i: (0, 0)),            # be1
            pl.BlockSpec((c_out, 9 * c_out), lambda i: (0, 0)),    # w2 stacked bf16
            pl.BlockSpec((c_out, 1), lambda i: (0, 0)),            # b2
            pl.BlockSpec((c_out, 1), lambda i: (0, 0)),            # g2
            pl.BlockSpec((c_out, 1), lambda i: (0, 0)),            # be2
            pl.BlockSpec((c_out, c_in), lambda i: (0, 0)),         # wsc
            pl.BlockSpec((c_out, 1), lambda i: (0, 0)),            # bsc
            pl.BlockSpec((c_out, c_out), lambda i: (0, 0)),        # gmat
            pl.BlockSpec((9, hw), lambda i: (0, 0)),               # boundary masks
        ],
        out_specs=pl.BlockSpec((None, c_out, hw), lambda i: (i, 0, 0)),
        scratch_shapes=[pltpu.VMEM((9 * c_in, hw), p1_dt),
                        pltpu.VMEM((9 * c_out, hw), p2_dt)],
        compiler_params=pltpu.CompilerParams(
            dimension_semantics=("parallel",),
            vmem_limit_bytes=vmem_limit),
    )(x_flat, w1s, vec(params["b1"]), vec(params["g1"]), vec(params["be1"]),
      w2s, vec(params["b2"]), vec(params["g2"]), vec(params["be2"]),
      wsc, bsc, gmat, masks)

    # Output is already NCHW-flat -> final reshape is free (no HBM pass).
    return out_flat.reshape(n, c_out, h, w)


# ------------------------- pure-JAX reference -------------------------

def _ref_conv(x, w, b, pad):
    y = lax.conv_general_dilated(
        x, w, window_strides=(1, 1), padding=((pad, pad), (pad, pad)),
        dimension_numbers=("NCHW", "OIHW", "NCHW"),
        precision=lax.Precision.HIGHEST)
    return y + b[None, :, None, None]


def _ref_groupnorm(y, gamma, beta, n_groups):
    n, c, h, w = y.shape
    yg = y.reshape(n, n_groups, c // n_groups, h, w)
    mean = yg.mean(axis=(2, 3, 4), keepdims=True)
    var = yg.var(axis=(2, 3, 4), keepdims=True)
    yn = ((yg - mean) / jnp.sqrt(var + EPS)).reshape(n, c, h, w)
    return yn * gamma[None, :, None, None] + beta[None, :, None, None]


def ref_resblock(x, p, n_groups):
    h = _ref_conv(x, p["w1"], p["b1"], 1)
    h = jax.nn.silu(_ref_groupnorm(h, p["g1"], p["be1"], n_groups))
    h = _ref_conv(h, p["w2"], p["b2"], 1)
    h = jax.nn.silu(_ref_groupnorm(h, p["g2"], p["be2"], n_groups))
    if p["w1"].shape[0] != x.shape[1]:
        sc = _ref_conv(x, p["wsc"], p["bsc"], 0)
    else:
        sc = x
    return h + sc


# ------------------------- main -------------------------

if __name__ == "__main__":
    N, DIM, DIM_OUT, H, W, N_GROUPS = 2, 4, 8, 16, 16, 4

    key = jax.random.PRNGKey(0)
    ks = jax.random.split(key, 16)

    def uinit(k, shape, fan_in):
        bound = 1.0 / (fan_in ** 0.5)
        return jax.random.uniform(k, shape, jnp.float32, -bound, bound)

    params = {
        "w1": uinit(ks[0], (DIM_OUT, DIM, 3, 3), DIM * 9),
        "b1": uinit(ks[1], (DIM_OUT,), DIM * 9),
        "g1": 1.0 + 0.1 * jax.random.normal(ks[2], (DIM_OUT,), jnp.float32),
        "be1": 0.1 * jax.random.normal(ks[3], (DIM_OUT,), jnp.float32),
        "w2": uinit(ks[4], (DIM_OUT, DIM_OUT, 3, 3), DIM_OUT * 9),
        "b2": uinit(ks[5], (DIM_OUT,), DIM_OUT * 9),
        "g2": 1.0 + 0.1 * jax.random.normal(ks[6], (DIM_OUT,), jnp.float32),
        "be2": 0.1 * jax.random.normal(ks[7], (DIM_OUT,), jnp.float32),
        "wsc": uinit(ks[8], (DIM_OUT, DIM, 1, 1), DIM),
        "bsc": uinit(ks[9], (DIM_OUT,), DIM),
    }
    x = jax.random.normal(ks[10], (N, DIM, H, W), jnp.float32)

    # Path 1: dim != dim_out (1x1-conv shortcut fused into the kernel).
    out = jax.block_until_ready(resblock_forward(x, params, n_groups=N_GROUPS))
    ref = jax.block_until_ready(ref_resblock(x, params, N_GROUPS))
    assert out.shape == (N, DIM_OUT, H, W), out.shape
    # bf16 MXU operands (f32 accumulation) vs a full-f32 reference -> ~1e-2 scale err.
    assert jnp.allclose(out, ref, rtol=3e-2, atol=3e-2), (
        float(jnp.max(jnp.abs(out - ref))))

    # Path 2: dim == dim_out (identity shortcut).
    params_id = {
        "w1": uinit(ks[11], (DIM_OUT, DIM_OUT, 3, 3), DIM_OUT * 9),
        "b1": uinit(ks[12], (DIM_OUT,), DIM_OUT * 9),
        "g1": params["g1"], "be1": params["be1"],
        "w2": params["w2"], "b2": params["b2"],
        "g2": params["g2"], "be2": params["be2"],
    }
    x_id = jax.random.normal(ks[13], (N, DIM_OUT, H, W), jnp.float32)
    out_id = jax.block_until_ready(resblock_forward(x_id, params_id, n_groups=N_GROUPS))
    ref_id = jax.block_until_ready(ref_resblock(x_id, params_id, N_GROUPS))
    assert out_id.shape == (N, DIM_OUT, H, W), out_id.shape
    assert jnp.allclose(out_id, ref_id, rtol=3e-2, atol=3e-2), (
        float(jnp.max(jnp.abs(out_id - ref_id))))

    print("KERNEL_OK")
</pallas_src>

<mosaic_0001>
module attributes {stable_mosaic.version = 11 : i64} {
  func.func @_resblock_kernel(%arg0: i32, %arg1: memref<1x4x256xf32, #tpu.memory_space<vmem>>, %arg2: memref<8x36xbf16, #tpu.memory_space<vmem>>, %arg3: memref<8x1xf32, #tpu.memory_space<vmem>>, %arg4: memref<8x1xf32, #tpu.memory_space<vmem>>, %arg5: memref<8x1xf32, #tpu.memory_space<vmem>>, %arg6: memref<8x72xbf16, #tpu.memory_space<vmem>>, %arg7: memref<8x1xf32, #tpu.memory_space<vmem>>, %arg8: memref<8x1xf32, #tpu.memory_space<vmem>>, %arg9: memref<8x1xf32, #tpu.memory_space<vmem>>, %arg10: memref<8x4xbf16, #tpu.memory_space<vmem>>, %arg11: memref<8x1xf32, #tpu.memory_space<vmem>>, %arg12: memref<8x8xf32, #tpu.memory_space<vmem>>, %arg13: memref<9x256xf32, #tpu.memory_space<vmem>>, %arg14: memref<1x8x256xf32, #tpu.memory_space<vmem>>, %arg15: memref<36x256xf32, #tpu.memory_space<vmem>>, %arg16: memref<72x256xf32, #tpu.memory_space<vmem>>) attributes {dimension_semantics = [#tpu.dimension_semantics<parallel>], iteration_bounds = array<i64: 2>, scalar_prefetch = 0 : i64, scratch_operands = 2 : i64, tpu.core_type = #tpu.core_type<tc>, window_params = [{transform_indices = @transform_0, window_bounds = array<i64: 1, 4, 256>}, {pipeline_mode = #tpu.pipeline_mode<synchronous>, transform_indices = @transform_1, window_bounds = array<i64: 8, 36>}, {pipeline_mode = #tpu.pipeline_mode<synchronous>, transform_indices = @transform_2, window_bounds = array<i64: 8, 1>}, {pipeline_mode = #tpu.pipeline_mode<synchronous>, transform_indices = @transform_3, window_bounds = array<i64: 8, 1>}, {pipeline_mode = #tpu.pipeline_mode<synchronous>, transform_indices = @transform_4, window_bounds = array<i64: 8, 1>}, {pipeline_mode = #tpu.pipeline_mode<synchronous>, transform_indices = @transform_5, window_bounds = array<i64: 8, 72>}, {pipeline_mode = #tpu.pipeline_mode<synchronous>, transform_indices = @transform_6, window_bounds = array<i64: 8, 1>}, {pipeline_mode = #tpu.pipeline_mode<synchronous>, transform_indices = @transform_7, window_bounds = array<i64: 8, 1>}, {pipeline_mode = #tpu.pipeline_mode<synchronous>, transform_indices = @transform_8, window_bounds = array<i64: 8, 1>}, {pipeline_mode = #tpu.pipeline_mode<synchronous>, transform_indices = @transform_9, window_bounds = array<i64: 8, 4>}, {pipeline_mode = #tpu.pipeline_mode<synchronous>, transform_indices = @transform_10, window_bounds = array<i64: 8, 1>}, {pipeline_mode = #tpu.pipeline_mode<synchronous>, transform_indices = @transform_11, window_bounds = array<i64: 8, 8>}, {pipeline_mode = #tpu.pipeline_mode<synchronous>, transform_indices = @transform_12, window_bounds = array<i64: 9, 256>}, {transform_indices = @transform_13, window_bounds = array<i64: 1, 8, 256>}]} {
    %c0 = arith.constant 0 : index
    %c0_0 = arith.constant 0 : index
    %0 = vector.load %arg13[%c0, %c0_0] : memref<9x256xf32, #tpu.memory_space<vmem>>, vector<9x256xf32>
    %c0_1 = arith.constant 0 : index
    %c0_2 = arith.constant 0 : index
    %c0_3 = arith.constant 0 : index
    %1 = vector.load %arg1[%c0_1, %c0_2, %c0_3] : memref<1x4x256xf32, #tpu.memory_space<vmem>>, vector<1x4x256xf32>
    %2 = vector.shape_cast %1 : vector<1x4x256xf32> to vector<4x256xf32>
    %c17_i32 = arith.constant 17 : i32
    %3 = tpu.dynamic_rotate %2 by %c17_i32 dim 1 : vector<4x256xf32>, i32 -> vector<4x256xf32>
    %4 = vector.extract_strided_slice %0 {offsets = [0, 0], sizes = [1, 256], strides = [1, 1]} : vector<9x256xf32> to vector<1x256xf32>
    %5 = vector.broadcast %4 : vector<1x256xf32> to vector<4x256xf32>
    %6 = arith.mulf %3, %5 : vector<4x256xf32>
    %c0_4 = arith.constant 0 : index
    %c0_5 = arith.constant 0 : index
    %7 = vector.load %arg15[%c0_4, %c0_5] : memref<36x256xf32, #tpu.memory_space<vmem>>, vector<4x256xf32>
    tpu.vector_store %arg15[%c0_4, %c0_5], %6 {strides = array<i32>} : memref<36x256xf32, #tpu.memory_space<vmem>>, vector<4x256xf32>,
    %c16_i32 = arith.constant 16 : i32
    %8 = tpu.dynamic_rotate %2 by %c16_i32 dim 1 : vector<4x256xf32>, i32 -> vector<4x256xf32>
    %9 = vector.extract_strided_slice %0 {offsets = [1, 0], sizes = [1, 256], strides = [1, 1]} : vector<9x256xf32> to vector<1x256xf32>
    %10 = vector.broadcast %9 : vector<1x256xf32> to vector<4x256xf32>
    %11 = arith.mulf %8, %10 : vector<4x256xf32>
    %c4 = arith.constant 4 : index
    %c0_6 = arith.constant 0 : index
    %12 = vector.load %arg15[%c4, %c0_6] : memref<36x256xf32, #tpu.memory_space<vmem>>, vector<4x256xf32>
    tpu.vector_store %arg15[%c4, %c0_6], %11 {strides = array<i32>} : memref<36x256xf32, #tpu.memory_space<vmem>>, vector<4x256xf32>,
    %c15_i32 = arith.constant 15 : i32
    %13 = tpu.dynamic_rotate %2 by %c15_i32 dim 1 : vector<4x256xf32>, i32 -> vector<4x256xf32>
    %14 = vector.extract_strided_slice %0 {offsets = [2, 0], sizes = [1, 256], strides = [1, 1]} : vector<9x256xf32> to vector<1x256xf32>
    %15 = vector.broadcast %14 : vector<1x256xf32> to vector<4x256xf32>
    %16 = arith.mulf %13, %15 : vector<4x256xf32>
    %c8 = arith.constant 8 : index
    %c0_7 = arith.constant 0 : index
    %17 = vector.load %arg15[%c8, %c0_7] : memref<36x256xf32, #tpu.memory_space<vmem>>, vector<4x256xf32>
    tpu.vector_store %arg15[%c8, %c0_7], %16 {strides = array<i32>} : memref<36x256xf32, #tpu.memory_space<vmem>>, vector<4x256xf32>,
    %c1_i32 = arith.constant 1 : i32
    %18 = tpu.dynamic_rotate %2 by %c1_i32 dim 1 : vector<4x256xf32>, i32 -> vector<4x256xf32>
    %19 = vector.extract_strided_slice %0 {offsets = [3, 0], sizes = [1, 256], strides = [1, 1]} : vector<9x256xf32> to vector<1x256xf32>
    %20 = vector.broadcast %19 : vector<1x256xf32> to vector<4x256xf32>
    %21 = arith.mulf %18, %20 : vector<4x256xf32>
    %c12 = arith.constant 12 : index
    %c0_8 = arith.constant 0 : index
    %22 = vector.load %arg15[%c12, %c0_8] : memref<36x256xf32, #tpu.memory_space<vmem>>, vector<4x256xf32>
    tpu.vector_store %arg15[%c12, %c0_8], %21 {strides = array<i32>} : memref<36x256xf32, #tpu.memory_space<vmem>>, vector<4x256xf32>,
    %c16 = arith.constant 16 : index
    %c0_9 = arith.constant 0 : index
    %23 = vector.load %arg15[%c16, %c0_9] : memref<36x256xf32, #tpu.memory_space<vmem>>, vector<4x256xf32>
    tpu.vector_store %arg15[%c16, %c0_9], %2 {strides = array<i32>} : memref<36x256xf32, #tpu.memory_space<vmem>>, vector<4x256xf32>,
    %c255_i32 = arith.constant 255 : i32
    %24 = tpu.dynamic_rotate %2 by %c255_i32 dim 1 : vector<4x256xf32>, i32 -> vector<4x256xf32>
    %25 = vector.extract_strided_slice %0 {offsets = [5, 0], sizes = [1, 256], strides = [1, 1]} : vector<9x256xf32> to vector<1x256xf32>
    %26 = vector.broadcast %25 : vector<1x256xf32> to vector<4x256xf32>
    %27 = arith.mulf %24, %26 : vector<4x256xf32>
    %c20 = arith.constant 20 : index
    %c0_10 = arith.constant 0 : index
    %28 = vector.load %arg15[%c20, %c0_10] : memref<36x256xf32, #tpu.memory_space<vmem>>, vector<4x256xf32>
    tpu.vector_store %arg15[%c20, %c0_10], %27 {strides = array<i32>} : memref<36x256xf32, #tpu.memory_space<vmem>>, vector<4x256xf32>,
    %c241_i32 = arith.constant 241 : i32
    %29 = tpu.dynamic_rotate %2 by %c241_i32 dim 1 : vector<4x256xf32>, i32 -> vector<4x256xf32>
    %30 = vector.extract_strided_slice %0 {offsets = [6, 0], sizes = [1, 256], strides = [1, 1]} : vector<9x256xf32> to vector<1x256xf32>
    %31 = vector.broadcast %30 : vector<1x256xf32> to vector<4x256xf32>
    %32 = arith.mulf %29, %31 : vector<4x256xf32>
    %c24 = arith.constant 24 : index
    %c0_11 = arith.constant 0 : index
    %33 = vector.load %arg15[%c24, %c0_11] : memref<36x256xf32, #tpu.memory_space<vmem>>, vector<4x256xf32>
    tpu.vector_store %arg15[%c24, %c0_11], %32 {strides = array<i32>} : memref<36x256xf32, #tpu.memory_space<vmem>>, vector<4x256xf32>,
    %c240_i32 = arith.constant 240 : i32
    %34 = tpu.dynamic_rotate %2 by %c240_i32 dim 1 : vector<4x256xf32>, i32 -> vector<4x256xf32>
    %35 = vector.extract_strided_slice %0 {offsets = [7, 0], sizes = [1, 256], strides = [1, 1]} : vector<9x256xf32> to vector<1x256xf32>
    %36 = vector.broadcast %35 : vector<1x256xf32> to vector<4x256xf32>
    %37 = arith.mulf %34, %36 : vector<4x256xf32>
    %c28 = arith.constant 28 : index
    %c0_12 = arith.constant 0 : index
    %38 = vector.load %arg15[%c28, %c0_12] : memref<36x256xf32, #tpu.memory_space<vmem>>, vector<4x256xf32>
    tpu.vector_store %arg15[%c28, %c0_12], %37 {strides = array<i32>} : memref<36x256xf32, #tpu.memory_space<vmem>>, vector<4x256xf32>,
    %c239_i32 = arith.constant 239 : i32
    %39 = tpu.dynamic_rotate %2 by %c239_i32 dim 1 : vector<4x256xf32>, i32 -> vector<4x256xf32>
    %40 = vector.extract_strided_slice %0 {offsets = [8, 0], sizes = [1, 256], strides = [1, 1]} : vector<9x256xf32> to vector<1x256xf32>
    %41 = vector.broadcast %40 : vector<1x256xf32> to vector<4x256xf32>
    %42 = arith.mulf %39, %41 : vector<4x256xf32>
    %c32 = arith.constant 32 : index
    %c0_13 = arith.constant 0 : index
    %43 = vector.load %arg15[%c32, %c0_13] : memref<36x256xf32, #tpu.memory_space<vmem>>, vector<4x256xf32>
    tpu.vector_store %arg15[%c32, %c0_13], %42 {strides = array<i32>} : memref<36x256xf32, #tpu.memory_space<vmem>>, vector<4x256xf32>,
    %c0_14 = arith.constant 0 : index
    %c0_15 = arith.constant 0 : index
    %44 = vector.load %arg2[%c0_14, %c0_15] : memref<8x36xbf16, #tpu.memory_space<vmem>>, vector<8x36xbf16>
    %c0_16 = arith.constant 0 : index
    %c0_17 = arith.constant 0 : index
    %45 = vector.load %arg15[%c0_16, %c0_17] : memref<36x256xf32, #tpu.memory_space<vmem>>, vector<36x256xf32>
    %46 = arith.truncf %45 : vector<36x256xf32> to vector<36x256xbf16>
    %cst = arith.constant dense<0.000000e+00> : vector<8x256xf32>
    %47 = tpu.matmul %44, %46, %cst {dimension_numbers = #tpu.dot_dimension_numbers<[1], [0], [0], [1], [0, 0, 1, 1], [], []>} : vector<8x36xbf16>, vector<36x256xbf16>, vector<8x256xf32> -> vector<8x256xf32>
    %c0_18 = arith.constant 0 : index
    %c0_19 = arith.constant 0 : index
    %48 = vector.load %arg3[%c0_18, %c0_19] : memref<8x1xf32, #tpu.memory_space<vmem>>, vector<8x1xf32>
    %49 = vector.broadcast %48 : vector<8x1xf32> to vector<8x256xf32>
    %50 = arith.addf %47, %49 : vector<8x256xf32>
    %cst_20 = arith.constant dense<0.000000e+00> : vector<8xf32>
    %51 = vector.multi_reduction <add>, %50, %cst_20 [1] : vector<8x256xf32> to vector<8xf32>
    %52 = vector.shape_cast %51 : vector<8xf32> to vector<8x1xf32>
    %53 = arith.mulf %50, %50 : vector<8x256xf32>
    %cst_21 = arith.constant dense<0.000000e+00> : vector<8xf32>
    %54 = vector.multi_reduction <add>, %53, %cst_21 [1] : vector<8x256xf32> to vector<8xf32>
    %55 = vector.shape_cast %54 : vector<8xf32> to vector<8x1xf32>
    %c0_22 = arith.constant 0 : index
    %c0_23 = arith.constant 0 : index
    %56 = vector.load %arg12[%c0_22, %c0_23] : memref<8x8xf32, #tpu.memory_space<vmem>>, vector<8x8xf32>
    %cst_24 = arith.constant dense<0.000000e+00> : vector<8x1xf32>
    %57 = tpu.matmul %56, %52, %cst_24 {dimension_numbers = #tpu.dot_dimension_numbers<[1], [0], [0], [1], [0, 0, 1, 1], [], []>} : vector<8x8xf32>, vector<8x1xf32>, vector<8x1xf32> -> vector<8x1xf32>
    %cst_25 = arith.constant dense<0.000000e+00> : vector<8x1xf32>
    %58 = tpu.matmul %56, %55, %cst_25 {dimension_numbers = #tpu.dot_dimension_numbers<[1], [0], [0], [1], [0, 0, 1, 1], [], []>} : vector<8x8xf32>, vector<8x1xf32>, vector<8x1xf32> -> vector<8x1xf32>
    %cst_26 = arith.constant 5.120000e+02 : f32
    %59 = vector.broadcast %cst_26 : f32 to vector<8x1xf32>
    %60 = arith.divf %57, %59 : vector<8x1xf32>
    %cst_27 = arith.constant 5.120000e+02 : f32
    %61 = vector.broadcast %cst_27 : f32 to vector<8x1xf32>
    %62 = arith.divf %58, %61 : vector<8x1xf32>
    %63 = arith.mulf %60, %60 : vector<8x1xf32>
    %64 = arith.subf %62, %63 : vector<8x1xf32>
    %cst_28 = arith.constant 0.000000e+00 : f32
    %65 = vector.broadcast %cst_28 : f32 to vector<8x1xf32>
    %66 = arith.maximumf %64, %65 : vector<8x1xf32>
    %67 = vector.broadcast %60 : vector<8x1xf32> to vector<8x256xf32>
    %68 = arith.subf %50, %67 : vector<8x256xf32>
    %cst_29 = arith.constant 9.99999974E-6 : f32
    %69 = vector.broadcast %cst_29 : f32 to vector<8x1xf32>
    %70 = arith.addf %66, %69 : vector<8x1xf32>
    %71 = math.rsqrt %70 : vector<8x1xf32>
    %72 = vector.broadcast %71 : vector<8x1xf32> to vector<8x256xf32>
    %73 = arith.mulf %68, %72 : vector<8x256xf32>
    %c0_30 = arith.constant 0 : index
    %c0_31 = arith.constant 0 : index
    %74 = vector.load %arg4[%c0_30, %c0_31] : memref<8x1xf32, #tpu.memory_space<vmem>>, vector<8x1xf32>
    %75 = vector.broadcast %74 : vector<8x1xf32> to vector<8x256xf32>
    %76 = arith.mulf %73, %75 : vector<8x256xf32>
    %c0_32 = arith.constant 0 : index
    %c0_33 = arith.constant 0 : index
    %77 = vector.load %arg5[%c0_32, %c0_33] : memref<8x1xf32, #tpu.memory_space<vmem>>, vector<8x1xf32>
    %78 = vector.broadcast %77 : vector<8x1xf32> to vector<8x256xf32>
    %79 = arith.addf %76, %78 : vector<8x256xf32>
    %80 = arith.negf %79 : vector<8x256xf32>
    %81 = math.exp %80 : vector<8x256xf32>
    %cst_34 = arith.constant 1.000000e+00 : f32
    %82 = vector.broadcast %cst_34 : f32 to vector<8x256xf32>
    %83 = arith.addf %82, %81 : vector<8x256xf32>
    %84 = arith.divf %82, %83 : vector<8x256xf32>
    %85 = arith.mulf %79, %84 : vector<8x256xf32>
    %c17_i32_35 = arith.constant 17 : i32
    %86 = tpu.dynamic_rotate %85 by %c17_i32_35 dim 1 : vector<8x256xf32>, i32 -> vector<8x256xf32>
    %87 = vector.extract_strided_slice %0 {offsets = [0, 0], sizes = [1, 256], strides = [1, 1]} : vector<9x256xf32> to vector<1x256xf32>
    %88 = vector.broadcast %87 : vector<1x256xf32> to vector<8x256xf32>
    %89 = arith.mulf %86, %88 : vector<8x256xf32>
    %c0_36 = arith.constant 0 : index
    %c0_37 = arith.constant 0 : index
    %90 = vector.load %arg16[%c0_36, %c0_37] : memref<72x256xf32, #tpu.memory_space<vmem>>, vector<8x256xf32>
    tpu.vector_store %arg16[%c0_36, %c0_37], %89 {strides = array<i32>} : memref<72x256xf32, #tpu.memory_space<vmem>>, vector<8x256xf32>,
    %c16_i32_38 = arith.constant 16 : i32
    %91 = tpu.dynamic_rotate %85 by %c16_i32_38 dim 1 : vector<8x256xf32>, i32 -> vector<8x256xf32>
    %92 = vector.extract_strided_slice %0 {offsets = [1, 0], sizes = [1, 256], strides = [1, 1]} : vector<9x256xf32> to vector<1x256xf32>
    %93 = vector.broadcast %92 : vector<1x256xf32> to vector<8x256xf32>
    %94 = arith.mulf %91, %93 : vector<8x256xf32>
    %c8_39 = arith.constant 8 : index
    %c0_40 = arith.constant 0 : index
    %95 = vector.load %arg16[%c8_39, %c0_40] : memref<72x256xf32, #tpu.memory_space<vmem>>, vector<8x256xf32>
    tpu.vector_store %arg16[%c8_39, %c0_40], %94 {strides = array<i32>} : memref<72x256xf32, #tpu.memory_space<vmem>>, vector<8x256xf32>,
    %c15_i32_41 = arith.constant 15 : i32
    %96 = tpu.dynamic_rotate %85 by %c15_i32_41 dim 1 : vector<8x256xf32>, i32 -> vector<8x256xf32>
    %97 = vector.extract_strided_slice %0 {offsets = [2, 0], sizes = [1, 256], strides = [1, 1]} : vector<9x256xf32> to vector<1x256xf32>
    %98 = vector.broadcast %97 : vector<1x256xf32> to vector<8x256xf32>
    %99 = arith.mulf %96, %98 : vector<8x256xf32>
    %c16_42 = arith.constant 16 : index
    %c0_43 = arith.constant 0 : index
    %100 = vector.load %arg16[%c16_42, %c0_43] : memref<72x256xf32, #tpu.memory_space<vmem>>, vector<8x256xf32>
    tpu.vector_store %arg16[%c16_42, %c0_43], %99 {strides = array<i32>} : memref<72x256xf32, #tpu.memory_space<vmem>>, vector<8x256xf32>,
    %c1_i32_44 = arith.constant 1 : i32
    %101 = tpu.dynamic_rotate %85 by %c1_i32_44 dim 1 : vector<8x256xf32>, i32 -> vector<8x256xf32>
    %102 = vector.extract_strided_slice %0 {offsets = [3, 0], sizes = [1, 256], strides = [1, 1]} : vector<9x256xf32> to vector<1x256xf32>
    %103 = vector.broadcast %102 : vector<1x256xf32> to vector<8x256xf32>
    %104 = arith.mulf %101, %103 : vector<8x256xf32>
    %c24_45 = arith.constant 24 : index
    %c0_46 = arith.constant 0 : index
    %105 = vector.load %arg16[%c24_45, %c0_46] : memref<72x256xf32, #tpu.memory_space<vmem>>, vector<8x256xf32>
    tpu.vector_store %arg16[%c24_45, %c0_46], %104 {strides = array<i32>} : memref<72x256xf32, #tpu.memory_space<vmem>>, vector<8x256xf32>,
    %c32_47 = arith.constant 32 : index
    %c0_48 = arith.constant 0 : index
    %106 = vector.load %arg16[%c32_47, %c0_48] : memref<72x256xf32, #tpu.memory_space<vmem>>, vector<8x256xf32>
    tpu.vector_store %arg16[%c32_47, %c0_48], %85 {strides = array<i32>} : memref<72x256xf32, #tpu.memory_space<vmem>>, vector<8x256xf32>,
    %c255_i32_49 = arith.constant 255 : i32
    %107 = tpu.dynamic_rotate %85 by %c255_i32_49 dim 1 : vector<8x256xf32>, i32 -> vector<8x256xf32>
    %108 = vector.extract_strided_slice %0 {offsets = [5, 0], sizes = [1, 256], strides = [1, 1]} : vector<9x256xf32> to vector<1x256xf32>
    %109 = vector.broadcast %108 : vector<1x256xf32> to vector<8x256xf32>
    %110 = arith.mulf %107, %109 : vector<8x256xf32>
    %c40 = arith.constant 40 : index
    %c0_50 = arith.constant 0 : index
    %111 = vector.load %arg16[%c40, %c0_50] : memref<72x256xf32, #tpu.memory_space<vmem>>, vector<8x256xf32>
    tpu.vector_store %arg16[%c40, %c0_50], %110 {strides = array<i32>} : memref<72x256xf32, #tpu.memory_space<vmem>>, vector<8x256xf32>,
    %c241_i32_51 = arith.constant 241 : i32
    %112 = tpu.dynamic_rotate %85 by %c241_i32_51 dim 1 : vector<8x256xf32>, i32 -> vector<8x256xf32>
    %113 = vector.extract_strided_slice %0 {offsets = [6, 0], sizes = [1, 256], strides = [1, 1]} : vector<9x256xf32> to vector<1x256xf32>
    %114 = vector.broadcast %113 : vector<1x256xf32> to vector<8x256xf32>
    %115 = arith.mulf %112, %114 : vector<8x256xf32>
    %c48 = arith.constant 48 : index
    %c0_52 = arith.constant 0 : index
    %116 = vector.load %arg16[%c48, %c0_52] : memref<72x256xf32, #tpu.memory_space<vmem>>, vector<8x256xf32>
    tpu.vector_store %arg16[%c48, %c0_52], %115 {strides = array<i32>} : memref<72x256xf32, #tpu.memory_space<vmem>>, vector<8x256xf32>,
    %c240_i32_53 = arith.constant 240 : i32
    %117 = tpu.dynamic_rotate %85 by %c240_i32_53 dim 1 : vector<8x256xf32>, i32 -> vector<8x256xf32>
    %118 = vector.extract_strided_slice %0 {offsets = [7, 0], sizes = [1, 256], strides = [1, 1]} : vector<9x256xf32> to vector<1x256xf32>
    %119 = vector.broadcast %118 : vector<1x256xf32> to vector<8x256xf32>
    %120 = arith.mulf %117, %119 : vector<8x256xf32>
    %c56 = arith.constant 56 : index
    %c0_54 = arith.constant 0 : index
    %121 = vector.load %arg16[%c56, %c0_54] : memref<72x256xf32, #tpu.memory_space<vmem>>, vector<8x256xf32>
    tpu.vector_store %arg16[%c56, %c0_54], %120 {strides = array<i32>} : memref<72x256xf32, #tpu.memory_space<vmem>>, vector<8x256xf32>,
    %c239_i32_55 = arith.constant 239 : i32
    %122 = tpu.dynamic_rotate %85 by %c239_i32_55 dim 1 : vector<8x256xf32>, i32 -> vector<8x256xf32>
    %123 = vector.extract_strided_slice %0 {offsets = [8, 0], sizes = [1, 256], strides = [1, 1]} : vector<9x256xf32> to vector<1x256xf32>
    %124 = vector.broadcast %123 : vector<1x256xf32> to vector<8x256xf32>
    %125 = arith.mulf %122, %124 : vector<8x256xf32>
    %c64 = arith.constant 64 : index
    %c0_56 = arith.constant 0 : index
    %126 = vector.load %arg16[%c64, %c0_56] : memref<72x256xf32, #tpu.memory_space<vmem>>, vector<8x256xf32>
    tpu.vector_store %arg16[%c64, %c0_56], %125 {strides = array<i32>} : memref<72x256xf32, #tpu.memory_space<vmem>>, vector<8x256xf32>,
    %c0_57 = arith.constant 0 : index
    %c0_58 = arith.constant 0 : index
    %127 = vector.load %arg6[%c0_57, %c0_58] : memref<8x72xbf16, #tpu.memory_space<vmem>>, vector<8x72xbf16>
    %c0_59 = arith.constant 0 : index
    %c0_60 = arith.constant 0 : index
    %128 = vector.load %arg16[%c0_59, %c0_60] : memref<72x256xf32, #tpu.memory_space<vmem>>, vector<72x256xf32>
    %129 = arith.truncf %128 : vector<72x256xf32> to vector<72x256xbf16>
    %cst_61 = arith.constant dense<0.000000e+00> : vector<8x256xf32>
    %130 = tpu.matmul %127, %129, %cst_61 {dimension_numbers = #tpu.dot_dimension_numbers<[1], [0], [0], [1], [0, 0, 1, 1], [], []>} : vector<8x72xbf16>, vector<72x256xbf16>, vector<8x256xf32> -> vector<8x256xf32>
    %c0_62 = arith.constant 0 : index
    %c0_63 = arith.constant 0 : index
    %131 = vector.load %arg7[%c0_62, %c0_63] : memref<8x1xf32, #tpu.memory_space<vmem>>, vector<8x1xf32>
    %132 = vector.broadcast %131 : vector<8x1xf32> to vector<8x256xf32>
    %133 = arith.addf %130, %132 : vector<8x256xf32>
    %cst_64 = arith.constant dense<0.000000e+00> : vector<8xf32>
    %134 = vector.multi_reduction <add>, %133, %cst_64 [1] : vector<8x256xf32> to vector<8xf32>
    %135 = vector.shape_cast %134 : vector<8xf32> to vector<8x1xf32>
    %136 = arith.mulf %133, %133 : vector<8x256xf32>
    %cst_65 = arith.constant dense<0.000000e+00> : vector<8xf32>
    %137 = vector.multi_reduction <add>, %136, %cst_65 [1] : vector<8x256xf32> to vector<8xf32>
    %138 = vector.shape_cast %137 : vector<8xf32> to vector<8x1xf32>
    %c0_66 = arith.constant 0 : index
    %c0_67 = arith.constant 0 : index
    %139 = vector.load %arg12[%c0_66, %c0_67] : memref<8x8xf32, #tpu.memory_space<vmem>>, vector<8x8xf32>
    %cst_68 = arith.constant dense<0.000000e+00> : vector<8x1xf32>
    %140 = tpu.matmul %139, %135, %cst_68 {dimension_numbers = #tpu.dot_dimension_numbers<[1], [0], [0], [1], [0, 0, 1, 1], [], []>} : vector<8x8xf32>, vector<8x1xf32>, vector<8x1xf32> -> vector<8x1xf32>
    %cst_69 = arith.constant dense<0.000000e+00> : vector<8x1xf32>
    %141 = tpu.matmul %139, %138, %cst_69 {dimension_numbers = #tpu.dot_dimension_numbers<[1], [0], [0], [1], [0, 0, 1, 1], [], []>} : vector<8x8xf32>, vector<8x1xf32>, vector<8x1xf32> -> vector<8x1xf32>
    %cst_70 = arith.constant 5.120000e+02 : f32
    %142 = vector.broadcast %cst_70 : f32 to vector<8x1xf32>
    %143 = arith.divf %140, %142 : vector<8x1xf32>
    %cst_71 = arith.constant 5.120000e+02 : f32
    %144 = vector.broadcast %cst_71 : f32 to vector<8x1xf32>
    %145 = arith.divf %141, %144 : vector<8x1xf32>
    %146 = arith.mulf %143, %143 : vector<8x1xf32>
    %147 = arith.subf %145, %146 : vector<8x1xf32>
    %cst_72 = arith.constant 0.000000e+00 : f32
    %148 = vector.broadcast %cst_72 : f32 to vector<8x1xf32>
    %149 = arith.maximumf %147, %148 : vector<8x1xf32>
    %150 = vector.broadcast %143 : vector<8x1xf32> to vector<8x256xf32>
    %151 = arith.subf %133, %150 : vector<8x256xf32>
    %cst_73 = arith.constant 9.99999974E-6 : f32
    %152 = vector.broadcast %cst_73 : f32 to vector<8x1xf32>
    %153 = arith.addf %149, %152 : vector<8x1xf32>
    %154 = math.rsqrt %153 : vector<8x1xf32>
    %155 = vector.broadcast %154 : vector<8x1xf32> to vector<8x256xf32>
    %156 = arith.mulf %151, %155 : vector<8x256xf32>
    %c0_74 = arith.constant 0 : index
    %c0_75 = arith.constant 0 : index
    %157 = vector.load %arg8[%c0_74, %c0_75] : memref<8x1xf32, #tpu.memory_space<vmem>>, vector<8x1xf32>
    %158 = vector.broadcast %157 : vector<8x1xf32> to vector<8x256xf32>
    %159 = arith.mulf %156, %158 : vector<8x256xf32>
    %c0_76 = arith.constant 0 : index
    %c0_77 = arith.constant 0 : index
    %160 = vector.load %arg9[%c0_76, %c0_77] : memref<8x1xf32, #tpu.memory_space<vmem>>, vector<8x1xf32>
    %161 = vector.broadcast %160 : vector<8x1xf32> to vector<8x256xf32>
    %162 = arith.addf %159, %161 : vector<8x256xf32>
    %163 = arith.negf %162 : vector<8x256xf32>
    %164 = math.exp %163 : vector<8x256xf32>
    %cst_78 = arith.constant 1.000000e+00 : f32
    %165 = vector.broadcast %cst_78 : f32 to vector<8x256xf32>
    %166 = arith.addf %165, %164 : vector<8x256xf32>
    %167 = arith.divf %165, %166 : vector<8x256xf32>
    %168 = arith.mulf %162, %167 : vector<8x256xf32>
    %c0_79 = arith.constant 0 : index
    %c0_80 = arith.constant 0 : index
    %169 = vector.load %arg10[%c0_79, %c0_80] : memref<8x4xbf16, #tpu.memory_space<vmem>>, vector<8x4xbf16>
    %170 = arith.truncf %2 : vector<4x256xf32> to vector<4x256xbf16>
    %cst_81 = arith.constant dense<0.000000e+00> : vector<8x256xf32>
    %171 = tpu.matmul %169, %170, %cst_81 {dimension_numbers = #tpu.dot_dimension_numbers<[1], [0], [0], [1], [0, 0, 1, 1], [], []>} : vector<8x4xbf16>, vector<4x256xbf16>, vector<8x256xf32> -> vector<8x256xf32>
    %c0_82 = arith.constant 0 : index
    %c0_83 = arith.constant 0 : index
    %172 = vector.load %arg11[%c0_82, %c0_83] : memref<8x1xf32, #tpu.memory_space<vmem>>, vector<8x1xf32>
    %173 = vector.broadcast %172 : vector<8x1xf32> to vector<8x256xf32>
    %174 = arith.addf %171, %173 : vector<8x256xf32>
    %175 = arith.addf %168, %174 : vector<8x256xf32>
    %c0_84 = arith.constant 0 : index
    %c0_85 = arith.constant 0 : index
    %c0_86 = arith.constant 0 : index
    %176 = vector.load %arg14[%c0_84, %c0_85, %c0_86] : memref<1x8x256xf32, #tpu.memory_space<vmem>>, vector<1x8x256xf32>
    %177 = vector.shape_cast %176 : vector<1x8x256xf32> to vector<8x256xf32>
    %178 = vector.shape_cast %175 : vector<8x256xf32> to vector<1x8x256xf32>
    tpu.vector_store %arg14[%c0_84, %c0_85, %c0_86], %178 {strides = array<i32>} : memref<1x8x256xf32, #tpu.memory_space<vmem>>, vector<1x8x256xf32>,
    return
  }
  func.func @transform_0(%arg0: i32) -> (i32, i32, i32) {
    %c0_i32 = arith.constant 0 : i32
    %c0_i32_0 = arith.constant 0 : i32
    %c0_i32_1 = arith.constant 0 : i32
    return %arg0, %c0_i32, %c0_i32_0 : i32, i32, i32
  }
  func.func @transform_1(%arg0: i32) -> (i32, i32) {
    %c0_i32 = arith.constant 0 : i32
    %c0_i32_0 = arith.constant 0 : i32
    %c0_i32_1 = arith.constant 0 : i32
    return %c0_i32, %c0_i32_0 : i32, i32
  }
  func.func @transform_2(%arg0: i32) -> (i32, i32) {
    %c0_i32 = arith.constant 0 : i32
    %c0_i32_0 = arith.constant 0 : i32
    %c0_i32_1 = arith.constant 0 : i32
    return %c0_i32, %c0_i32_0 : i32, i32
  }
  func.func @transform_3(%arg0: i32) -> (i32, i32) {
    %c0_i32 = arith.constant 0 : i32
    %c0_i32_0 = arith.constant 0 : i32
    %c0_i32_1 = arith.constant 0 : i32
    return %c0_i32, %c0_i32_0 : i32, i32
  }
  func.func @transform_4(%arg0: i32) -> (i32, i32) {
    %c0_i32 = arith.constant 0 : i32
    %c0_i32_0 = arith.constant 0 : i32
    %c0_i32_1 = arith.constant 0 : i32
    return %c0_i32, %c0_i32_0 : i32, i32
  }
  func.func @transform_5(%arg0: i32) -> (i32, i32) {
    %c0_i32 = arith.constant 0 : i32
    %c0_i32_0 = arith.constant 0 : i32
    %c0_i32_1 = arith.constant 0 : i32
    return %c0_i32, %c0_i32_0 : i32, i32
  }
  func.func @transform_6(%arg0: i32) -> (i32, i32) {
    %c0_i32 = arith.constant 0 : i32
    %c0_i32_0 = arith.constant 0 : i32
    %c0_i32_1 = arith.constant 0 : i32
    return %c0_i32, %c0_i32_0 : i32, i32
  }
  func.func @transform_7(%arg0: i32) -> (i32, i32) {
    %c0_i32 = arith.constant 0 : i32
    %c0_i32_0 = arith.constant 0 : i32
    %c0_i32_1 = arith.constant 0 : i32
    return %c0_i32, %c0_i32_0 : i32, i32
  }
  func.func @transform_8(%arg0: i32) -> (i32, i32) {
    %c0_i32 = arith.constant 0 : i32
    %c0_i32_0 = arith.constant 0 : i32
    %c0_i32_1 = arith.constant 0 : i32
    return %c0_i32, %c0_i32_0 : i32, i32
  }
  func.func @transform_9(%arg0: i32) -> (i32, i32) {
    %c0_i32 = arith.constant 0 : i32
    %c0_i32_0 = arith.constant 0 : i32
    %c0_i32_1 = arith.constant 0 : i32
    return %c0_i32, %c0_i32_0 : i32, i32
  }
  func.func @transform_10(%arg0: i32) -> (i32, i32) {
    %c0_i32 = arith.constant 0 : i32
    %c0_i32_0 = arith.constant 0 : i32
    %c0_i32_1 = arith.constant 0 : i32
    return %c0_i32, %c0_i32_0 : i32, i32
  }
  func.func @transform_11(%arg0: i32) -> (i32, i32) {
    %c0_i32 = arith.constant 0 : i32
    %c0_i32_0 = arith.constant 0 : i32
    %c0_i32_1 = arith.constant 0 : i32
    return %c0_i32, %c0_i32_0 : i32, i32
  }
  func.func @transform_12(%arg0: i32) -> (i32, i32) {
    %c0_i32 = arith.constant 0 : i32
    %c0_i32_0 = arith.constant 0 : i32
    %c0_i32_1 = arith.constant 0 : i32
    return %c0_i32, %c0_i32_0 : i32, i32
  }
  func.func @transform_13(%arg0: i32) -> (i32, i32, i32) {
    %c0_i32 = arith.constant 0 : i32
    %c0_i32_0 = arith.constant 0 : i32
    %c0_i32_1 = arith.constant 0 : i32
    return %arg0, %c0_i32, %c0_i32_0 : i32, i32, i32
  }
}

</mosaic_0001>

<bundles_post_ra>
// kernel: resblock_forward.1
= control target key start
LH: loop header
LB: loop body
LE: loop exit
PB: predicated region body
PF: predicated region fallthrough
CT: control target
= control target key end

     0   :  { %s1589_s25 = smov 0   ;;  %s1922_s0 = inlined_call_operand.vmem [shape: f32[2,4,256], index: 0, kind: input, shape index: {}]   ;;  %s1923_s1 = inlined_call_operand.vmem [shape: bf16[8,36], index: 1, kind: input, shape index: {}]   ;;  %s1924_s2 = inlined_call_operand.vmem [shape: f32[8,1], index: 2, kind: input, shape index: {}]   ;;  %s1925_s3 = inlined_call_operand.vmem [shape: f32[8,1], index: 3, kind: input, shape index: {}]   ;;  %s1926_s4 = inlined_call_operand.vmem [shape: f32[8,1], index: 4, kind: input, shape index: {}]   ;;  %s1927_s5 = inlined_call_operand.vmem [shape: bf16[8,72], index: 5, kind: input, shape index: {}]   ;;  %s1928_s6 = inlined_call_operand.vmem [shape: f32[8,1], index: 6, kind: input, shape index: {}]   ;;  %s1929_s7 = inlined_call_operand.vmem [shape: f32[8,1], index: 7, kind: input, shape index: {}]   ;;  %s1930_s8 = inlined_call_operand.vmem [shape: f32[8,1], index: 8, kind: input, shape index: {}]   ;;  %s1931_s9 = inlined_call_operand.vmem [shape: bf16[8,4], index: 9, kind: input, shape index: {}]   ;;  %s1932_s10 = inlined_call_operand.vmem [shape: f32[8,1], index: 10, kind: input, shape index: {}]   ;;  %s1933_s11 = inlined_call_operand.vmem [shape: f32[8,8], index: 11, kind: input, shape index: {}]   ;;  %s1934_s12 = inlined_call_operand.vmem [shape: f32[9,256], index: 12, kind: input, shape index: {}]   ;;  %s1935_s13 = inlined_call_operand.vmem [shape: f32[2,8,256], index: 13, kind: output, shape index: {}]  }
   0x1 LB: > { %s1401_s26 = sadd.s32 4294967295, %s1506_s25   ;;  %p1405_p0 = scmp.ge.s32.totalorder %s1506_s25, 1  ;;  %s1506_s25 = sphi %s1589_s25, %s23_s25  }
   0x2   : > { %p387_p1 = scmp.lt.s32.totalorder %s1506_s25, 3 }
   0x4   : > { %p388_p2 = pnand %p1405_p0, %p387_p1 }
   0x5   : > { %p431_p3 = scmp.lt.s32.totalorder (!%p388_p2), %s1401_s26, 1  ;;  %s1508_s14 = smov (!%p388_p2), 1   ;;  %v1516_v2 = vmov (!%p388_p2), 0   ;;  %v647_v3 = vld [vmem:[%s1924_s2] sm:$0xff] (!%p388_p2)  ;;  %v454_v4 = vlaneseq (!%p388_p2)  ;;  %v1662_v9 = vld [vmem:[%s1934_s12 + $0x8] sm:$0xff] (!%p388_p2)  ;;  %vm657_vm8 = vcmask (!%p388_p2), 1041408  }
   0x6   : > { %391 = sbr.rel (%p388_p2) target bundleno = 1850 (0x73a), region = 72  ;;  %s1509_s15 = smov (!%p388_p2), 16   ;;  %696 = vmatprep.mubr.bf16.mxu0 (!%p388_p2), %v1516_v2  ;;  %1477 = vset.pattern.permute.xlu0 (!%p388_p2), %v1516_v2  ;;  %v1657_v8 = vld [vmem:[%s1934_s12] sm:$0xff] (!%p388_p2)  ;;  %vm653_vm9 = vcmask (!%p388_p2), 293888   ;;  %vm1518_vm10 = vmmov (!%p388_p2), 0   ;;  %vm714_vm11 = vcmask (!%p388_p2), 64512  }
   0x7   : > { %s1510_s16 = smov (!%p388_p2), 17   ;;  %s1511_s17 = smov (!%p388_p2), 15   ;;  %1478 = vset.pattern.permute.xlu1 (!%p388_p2), %v1516_v2  ;;  %v1649_v5 = vshrl.u32 (!%p388_p2), %v454_v4, 7  ;;  %v1651_v6 = vand.u32 (!%p388_p2), 127, %v454_v4  ;;  %vm1031_vm12 = vcmask (!%p388_p2), 1043456   ;;  %vm1027_vm13 = vcmask (!%p388_p2), 588800  }
   0x8   : > { %s1512_s18 = smov (!%p388_p2), 127   ;;  %s1513_s19 = smov (!%p388_p2), 112   ;;  %vm1291_vm14 = vcmask (!%p388_p2), 31744  }
   0x9   : > { %s1514_s20 = smov (!%p388_p2), 113   ;;  %s1515_s21 = smov (!%p388_p2), 111   ;;  %v524_v7 = vsub.s32 (!%p388_p2), 3, %v1649_v5  ;;  %v461_v12 = vsub.s32 (!%p388_p2), 0, %v1649_v5  ;;  %vm519_vm0 = vcmp.lt.s32.totalorder (!%p388_p2), %v1651_v6, 1  ;;  %v480_v15 = vsub.s32 (!%p388_p2), 1, %v1649_v5 }
   0xa   : > { %vm456_vm1 = vcmp.lt.s32.totalorder (!%p388_p2), %v1651_v6, 17  ;;  %vm475_vm2 = vcmp.lt.s32.totalorder (!%p388_p2), %v1651_v6, 16  ;;  %v505_v18 = vsub.s32 (!%p388_p2), 2, %v1649_v5  ;;  %vm500_vm3 = vcmp.lt.s32.totalorder (!%p388_p2), %v1651_v6, 15 }
   0xb   : > { %v1667_v13 = vrot.slane (!%p388_p2), %v1657_v8, %v524_v7  ;;  %v1670_v14 = vrot.slane (!%p388_p2), %v1662_v9, %v524_v7  ;;  %v1681_v21 = vrot.slane (!%p388_p2), %v1657_v8, %v461_v12  ;;  %v1684_v22 = vrot.slane (!%p388_p2), %v1662_v9, %v461_v12 }
   0xc   : > { %v1689_v25 = vrot.slane (!%p388_p2), %v1657_v8, %v480_v15  ;;  %v1692_v26 = vrot.slane (!%p388_p2), %v1662_v9, %v480_v15  ;;  %v551_v27 = vsub.s32 (!%p388_p2), 5, %v1649_v5  ;;  %v1697_v32 = vrot.slane (!%p388_p2), %v1657_v8, %v505_v18 }
   0xd   : > { %s1937_s26 = smov (!%p431_p3, %s1401_s26), 1  ;;  %v1700_v33 = vrot.slane %v1662_v9, %v505_v18  ;;  %vm546_vm4 = vcmp.lt.s32.totalorder %v1651_v6, 127  ;;  %v595_v48 = vsub.s32 7, %v1649_v5  ;;  %vm590_vm5 = vcmp.lt.s32.totalorder %v1651_v6, 112 }
   0xe   : > { %s1428_s27 = sshll.u32 %s1937_s26, 3  ;;  %v1723_v51 = vrot.slane %v1657_v8, %v551_v27  ;;  %v1726_v52 = vrot.slane %v1662_v9, %v551_v27  ;;  %v576_v61 = vsub.s32 6, %v1649_v5  ;;  %vm571_vm6 = vcmp.lt.s32.totalorder %v1651_v6, 113  ;;  %s1429_s23 = sshll.u32 %s1937_s26, 4 }
   0xf   : > { %s435_s30 = scalar_lea.vmem %s1922_s0, %s1428_s27  ;;  %v1734_v57 = vrot.slane %v1657_v8, %v595_v48  ;;  %v1739_v60 = vrot.slane %v1662_v9, %v595_v48  ;;  %vm615_vm7 = vcmp.lt.s32.totalorder %v1651_v6, 111 }
  0x10   : > { %v1603_v0 = vld [vmem:[%s435_s30] sm:$0xff]  ;;  %v1750_v5 = vrot.slane %v1657_v8, %v576_v61  ;;  %v1753_v15 = vrot.slane %v1662_v9, %v576_v61 }
  0x11   : > { %515 = vrot.lane.b32.xlu1 %v1603_v0, %s1508_s14  ;;  %540 = vst [vmem:[#allocation2 + $0x20] sm:$0xf] %v1603_v0  ;;  %471 = vrot.lane.b32.xlu0 %v1603_v0, %s1509_s15  ;;  %v1612_v1 = vcombine.high %v1603_v0, %v1603_v0 }
  0x13   : > { %541 = vst [vmem:[#allocation2 + $0x28] sm:$0xf] %v1612_v1 }
  0x15   : > { %450 = vrot.lane.b32.xlu0 %v1603_v0, %s1510_s16  ;;  %517 = vrot.lane.b32.xlu1 %v1612_v1, %s1508_s14 }
  0x19   : > { %452 = vrot.lane.b32.xlu1 %v1612_v1, %s1510_s16  ;;  %473 = vrot.lane.b32.xlu0 %v1612_v1, %s1509_s15 }
  0x1d   : > { %498 = vrot.lane.b32.xlu1 %v1612_v1, %s1511_s17  ;;  %496 = vrot.lane.b32.xlu0 %v1603_v0, %s1511_s17 }
  0x21   : > { %544 = vrot.lane.b32.xlu1 %v1612_v1, %s1512_s18  ;;  %542 = vrot.lane.b32.xlu0 %v1603_v0, %s1512_s18 }
  0x25   : > { %588 = vrot.lane.b32.xlu1 %v1612_v1, %s1513_s19  ;;  %586 = vrot.lane.b32.xlu0 %v1603_v0, %s1513_s19 }
  0x29   : > { %569 = vrot.lane.b32.xlu1 %v1612_v1, %s1514_s20  ;;  %567 = vrot.lane.b32.xlu0 %v1603_v0, %s1514_s20 }
  0x2d   : > { %613 = vrot.lane.b32.xlu1 %v1612_v1, %s1515_s21  ;;  %611 = vrot.lane.b32.xlu0 %v1603_v0, %s1515_s21 }
  0x31   : > { %650 = vperm.xlu0 %1477, %v647_v3  }
  0x83   : > { %v516_v10 = vpop.permute.xlu1 %515  ;;  %v472_v11 = vpop.permute.xlu0 %471 }
  0x87   : > { %v451_v16 = vpop.permute.xlu0 %450  ;;  %v518_v17 = vpop.permute.xlu1 %517 }
  0x88   : > { %v520_v19 = vsel %vm519_vm0, %v516_v10, %v518_v17  ;;  %v521_v20 = vsel %vm519_vm0, %v518_v17, %v516_v10 }
  0x89   : > { %v530_v23 = vmul.f32 %v1667_v13, %v521_v20  ;;  %v531_v24 = vmul.f32 %v1670_v14, %v520_v19 }
  0x8b   : > { %v534_v28 = vrot.slane %v530_v23, 4  ;;  %v535_v29 = vrot.slane %v531_v24, 4  ;;  %v453_v30 = vpop.permute.xlu1 %452  ;;  %v474_v31 = vpop.permute.xlu0 %473 }
  0x8c   : > { %v457_v34 = vsel %vm456_vm1, %v451_v16, %v453_v30  ;;  %v458_v35 = vsel %vm456_vm1, %v453_v30, %v451_v16  ;;  %v476_v36 = vsel %vm475_vm2, %v472_v11, %v474_v31  ;;  %v477_v37 = vsel %vm475_vm2, %v474_v31, %v472_v11 }
  0x8d   : > { %538 = vst [vmem:[#allocation2 + $0x10] sm:$0xf0] %v534_v28  ;;  %539 = vst [vmem:[#allocation2 + $0x18] sm:$0xf0] %v535_v29  ;;  %v467_v38 = vmul.f32 %v1681_v21, %v458_v35  ;;  %v468_v39 = vmul.f32 %v1684_v22, %v457_v34  ;;  %v486_v40 = vmul.f32 %v1689_v25, %v477_v37  ;;  %v1765_v34 = vld [vmem:[%s1934_s12 + $0x10] ss:$0 sm:$0xff] }
  0x8e   : > { %v487_v41 = vmul.f32 %v1692_v26, %v476_v36  ;;  %v1770_v35 = vld [vmem:[%s1934_s12 + $0x18] ss:$0 sm:$0xff] }
  0x8f   : > { %469 = vst [vmem:[#allocation2] sm:$0xf] %v467_v38  ;;  %470 = vst [vmem:[#allocation2 + $0x8] sm:$0xf] %v468_v39  ;;  %v490_v42 = vrot.slane %v486_v40, 4  ;;  %v499_v44 = vpop.permute.xlu1 %498  ;;  %v497_v45 = vpop.permute.xlu0 %496 }
  0x90   : > { %v491_v43 = vrot.slane %v487_v41, 4  ;;  %v501_v46 = vsel %vm500_vm3, %v497_v45, %v499_v44  ;;  %v502_v47 = vsel %vm500_vm3, %v499_v44, %v497_v45 }
  0x91   : > { %494 = vst [vmem:[#allocation2] sm:$0xf0] %v490_v42  ;;  %v511_v49 = vmul.f32 %v1697_v32, %v502_v47  ;;  %v512_v50 = vmul.f32 %v1700_v33, %v501_v46 }
  0x92   : > { %495 = vst [vmem:[#allocation2 + $0x8] sm:$0xf0] %v491_v43 }
  0x93   : > { %513 = vst [vmem:[#allocation2 + $0x10] sm:$0xf] %v511_v49  ;;  %514 = vst [vmem:[#allocation2 + $0x18] sm:$0xf] %v512_v50  ;;  %v545_v53 = vpop.permute.xlu1 %544  ;;  %v543_v54 = vpop.permute.xlu0 %542 }
  0x94   : > { %v547_v55 = vsel %vm546_vm4, %v543_v54, %v545_v53  ;;  %v548_v56 = vsel %vm546_vm4, %v545_v53, %v543_v54 }
  0x95   : > { %v557_v58 = vmul.f32 %v1723_v51, %v547_v55  ;;  %v558_v59 = vmul.f32 %v1726_v52, %v548_v56  ;;  %v630_v55 = vld [vmem:[%s1923_s1] sm:$0xf]  ;;  %v1517_v56 = vmov 0.0  }
  0x96   : > { %1438 = vmatprep.subr.mxu1 %v1517_v56  ;;  %1440 = vmatprep.mubr.msk.f32.mxu1 %vm1518_vm10, %v1517_v56 }
  0x97   : > { %v561_v62 = vrot.slane %v557_v58, 4  ;;  %v562_v63 = vrot.slane %v558_v59, 4  ;;  %v589_v3 = vpop.permute.xlu1 %588  ;;  %v587_v4 = vpop.permute.xlu0 %586 }
  0x98   : > { %v591_v7 = vsel %vm590_vm5, %v587_v4, %v589_v3  ;;  %v592_v10 = vsel %vm590_vm5, %v589_v3, %v587_v4  ;;  %v631_v18 = vld [vmem:[#allocation2] sm:$0xff] }
  0x99   : > { %565 = vst [vmem:[#allocation2 + $0x20] sm:$0xf0] %v561_v62  ;;  %566 = vst [vmem:[#allocation2 + $0x28] sm:$0xf0] %v562_v63  ;;  %v601_v11 = vmul.f32 %v1734_v57, %v591_v7  ;;  %v602_v12 = vmul.f32 %v1739_v60, %v592_v10  ;;  %v632_v16 = vld [vmem:[#allocation2 + $0x8] sm:$0xff] }
  0x9a   : > { %v634_v17 = vld [vmem:[#allocation2 + $0x18] sm:$0xff]  ;;  %v633_v19 = vld [vmem:[#allocation2 + $0x10] sm:$0xff] }
  0x9b   : > { %v605_v20 = vrot.slane %v601_v11, 4  ;;  %v606_v23 = vrot.slane %v602_v12, 4  ;;  %v570_v24 = vpop.permute.xlu1 %569  ;;  %v568_v27 = vpop.permute.xlu0 %567  ;;  %v642_v28 = vpack.c.bf16 %v634_v17, %v632_v16  ;;  %v641_v29 = vpack.c.bf16 %v633_v19, %v631_v18  ;;  %v1792_v16 = vld [vmem:[%s1933_s11] sm:$0xff] }
  0x9c   : > { %v572_v30 = vsel %vm571_vm6, %v568_v27, %v570_v24  ;;  %v573_v8 = vsel %vm571_vm6, %v570_v24, %v568_v27  ;;  %v880_v27 = vld [vmem:[%s1925_s3] sm:$0xff] }
  0x9d   : > { %609 = vst [vmem:[#allocation2 + $0x30] sm:$0xf0] %v605_v20  ;;  %610 = vst [vmem:[#allocation2 + $0x38] sm:$0xf0] %v606_v23  ;;  %v582_v9 = vmul.f32 %v1750_v5, %v572_v30  ;;  %v583_v31 = vmul.f32 %v1753_v15, %v573_v8  ;;  %664 = vmatprep.subr.bf16.mxu0 %v642_v28 }
  0x9e   : > { %665 = vmatpush1.bf16.msra.mxu0 %v641_v29 }
  0x9f   : > { %584 = vst [vmem:[#allocation2 + $0x30] sm:$0xf] %v582_v9  ;;  %585 = vst [vmem:[#allocation2 + $0x38] sm:$0xf] %v583_v31  ;;  %v614_v36 = vpop.permute.xlu1 %613  ;;  %v612_v37 = vpop.permute.xlu0 %611  ;;  %v888_v9 = vld [vmem:[%s1926_s4] sm:$0xff] }
  0xa0   : > { %v616_v38 = vsel %vm615_vm7, %v612_v37, %v614_v36  ;;  %v617_v39 = vsel %vm615_vm7, %v614_v36, %v612_v37  ;;  %v636_v42 = vld [vmem:[#allocation2 + $0x28] sm:$0xff]  ;;  %v635_v44 = vld [vmem:[#allocation2 + $0x20] sm:$0xff] }
  0xa1   : > { %v626_v40 = vmul.f32 %v1765_v34, %v616_v38  ;;  %v627_v41 = vmul.f32 %v1770_v35, %v617_v39 }
  0xa3   : > { %628 = vst [vmem:[#allocation2 + $0x40] sm:$0xf] %v626_v40  ;;  %629 = vst [vmem:[#allocation2 + $0x48] sm:$0xf] %v627_v41 }
  0xa6   : > { %v638_v43 = vld [vmem:[#allocation2 + $0x38] sm:$0xff]  ;;  %v637_v45 = vld [vmem:[#allocation2 + $0x30] sm:$0xff] }
  0xa7   : > { %v644_v46 = vpack.c.bf16 %v638_v43, %v636_v42  ;;  %v643_v47 = vpack.c.bf16 %v637_v45, %v635_v44 }
  0xa9   : > { %666 = vmatprep.subr.bf16.mxu0 %v644_v46 }
  0xaa   : > { %667 = vmatpush1.bf16.msra.mxu0 %v643_v47  ;;  %v640_v48 = vld [vmem:[#allocation2 + $0x48] sm:$0xf]  ;;  %v639_v49 = vld [vmem:[#allocation2 + $0x40] sm:$0xf] }
  0xab   : > { %v646_v50 = vpack.c.bf16 %v640_v48, %v640_v48  ;;  %v645_v53 = vpack.c.bf16 %v639_v49, %v639_v49 }
  0xad   : > { %1412 = vmatprep.subr.msk.bf16.mxu0 %vm657_vm8, %v646_v50  ;;  %v659_v54 = vsel %vm657_vm8, %v645_v53, 0 }
  0xae   : > { %669 = vmatpush1.bf16.msra.mxu0 %v659_v54 }
  0xaf   : > { %1448 = vmatprep.subr.mxu0 %v1517_v56 }
  0xb0   : > { %v651_v58 = vpop.permute.xlu0 %650 }
  0xb1   : > { %1413 = vmatmul.mubr.msk.bf16.vlgmr.msra.gmra.mrb[0].mxu0 %vm653_vm9, %v630_v55 }
  0xb2   : > { %1450 = vmatprep.mubr.msk.f32.mxu0 %vm1518_vm10, %v1517_v56 }
 0x184   : > { %v698_v59 = vpop.f32.mrb[0].mxu0 }
 0x185   : > { %v699_v61 = vadd.f32 %v698_v59, %v651_v58  ;;  %v700_v62 = vpop.f32.mrb[1].mxu0 }
 0x186   : > { %v701_v63 = vadd.f32 %v700_v62, %v651_v58  ;;  %v702_v3 = vpop.f32.mrb[2].mxu0 }
 0x187   : > { %v703_v4 = vpop.f32.mrb[3].mxu0  ;;  %v708_v7 = vmul.f32 %v699_v61, %v699_v61 }
 0x188   : > { %v705_v10 = vadd.f32 %v701_v63, %v699_v61  ;;  %v709_v11 = vmul.f32 %v701_v63, %v701_v63  ;;  %v1021_v4 = vld [vmem:[%s1928_s6] sm:$0xff] }
 0x18a   : > { %706 = vadd.xlane.f32.xlu1 %v705_v10  ;;  %v710_v12 = vadd.f32 %v709_v11, %v708_v7 }
 0x18c   : > { %711 = vadd.xlane.f32.xlu0 %v710_v12 }
 0x217   : > { %v707_v17 = vpop.xlane.xlu1 %706 }
 0x218   : > { %1439 = vmatpush3.msra.mxu1 %v707_v17 }
 0x219   : > { %v712_v18 = vpop.xlane.xlu0 %711  ;;  %1441 = vmatmul.mubr.msk.f32.vlgmr.msra.gmra.mrb[0].mxu1 %vm714_vm11, %v1792_v16  ;;  %1443 = vmatprep.subr.mxu1 %v1517_v56 }
 0x21a   : > { %1444 = vmatpush3.msra.mxu1 %v712_v18  ;;  %1445 = vmatprep.mubr.msk.f32.mxu1 %vm1518_vm10, %v1517_v56 }
 0x21d   : > { %1446 = vmatmul.mubr.msk.f32.vlgmr.msra.gmra.mrb[2].mxu1 %vm714_vm11, %v1792_v16 }
 0x21e   : > { %1070 = vmatprep.mubr.bf16.mxu1 %v1516_v2 }
 0x2ec   : > { %v784_v19 = vpop.f32.mrb[0].mxu1 }
 0x2ed   : > { %v859_v20 = vmul.f32 0.001953125, %v784_v19  ;;  %v1442_v23 = vpop.f32.mrb[1].mxu1 }
 0x2ef   : > { %866 = vperm.xlu1 %1478, %v859_v20   ;;  %v861_v28 = vmul.f32 %v859_v20, %v859_v20 }
 0x2f0   : > { %v854_v24 = vpop.f32.mrb[2].mxu1 }
 0x2f1   : > { %v860_v29 = vmul.f32 0.001953125, %v854_v24  ;;  %v1447_v30 = vpop.f32.mrb[3].mxu1 }
 0x2f3   : > { %v862_v8 = vsub.f32 %v860_v29, %v861_v28  ;;  %883 = vperm.xlu1 %1478, %v880_v27  }
 0x2f5   : > { %v863_v31 = vmax.f32 %v862_v8, 0.0 }
 0x2f7   : > { %v871_v36 = vadd.f32 1e-05, %v863_v31  ;;  %891 = vperm.xlu1 %1478, %v888_v9  }
 0x2f9   : > { %1480 = vrsqrt.f32 %v871_v36 }
 0x303   : > { %v1481_v37 = vpop.eup %1480 }
 0x304   : > { %875 = vperm.xlu0 %1477, %v1481_v37  }
 0x36e   : > { %v867_v38 = vpop.permute.xlu1 %866 }
 0x36f   : > { %v869_v40 = vsub.f32 %v699_v61, %v867_v38  ;;  %v870_v41 = vsub.f32 %v701_v63, %v867_v38 }
 0x372   : > { %v884_v39 = vpop.permute.xlu1 %883 }
 0x376   : > { %v892_v47 = vpop.permute.xlu1 %891 }
 0x383   : > { %v876_v42 = vpop.permute.xlu0 %875 }
 0x384   : > { %v878_v43 = vmul.f32 %v876_v42, %v869_v40  ;;  %v879_v44 = vmul.f32 %v876_v42, %v870_v41 }
 0x386   : > { %v886_v45 = vmul.f32 %v884_v39, %v878_v43  ;;  %v887_v46 = vmul.f32 %v884_v39, %v879_v44 }
 0x388   : > { %v894_v48 = vadd.f32 %v892_v47, %v886_v45  ;;  %v895_v49 = vadd.f32 %v892_v47, %v887_v46 }
 0x38a   : > { %v1416_v50 = vmul.f32 -1.442695, %v894_v48  ;;  %v1417_v53 = vmul.f32 -1.442695, %v895_v49 }
 0x38c   : > { %1482 = vpow2.f32 %v1416_v50 }
 0x38d   : > { %1484 = vpow2.f32 %v1417_v53 }
 0x396   : > { %v1483_v54 = vpop.eup %1482 }
 0x397   : > { %v1485_v55 = vpop.eup %1484  ;;  %v902_v58 = vadd.f32 1.0, %v1483_v54 }
 0x398   : > { %v903_v59 = vadd.f32 1.0, %v1485_v55 }
 0x399   : > { %1486 = vrcp.f32 %v902_v58 }
 0x39a   : > { %1488 = vrcp.f32 %v903_v59 }
 0x3a3   : > { %v1487_v61 = vpop.eup %1486 }
 0x3a4   : > { %v1489_v62 = vpop.eup %1488  ;;  %v1808_v63 = vmul.f32 %v1487_v61, %v894_v48 }
 0x3a5   : > { %v909_v3 = vmul.f32 %v1489_v62, %v895_v49 }
 0x3a6   : > { %910 = vrot.lane.b32.xlu0 %v1808_v63, %s1510_s16 }
 0x3a7   : > { %912 = vrot.lane.b32.xlu1 %v909_v3, %s1510_s16 }
 0x3aa   : > { %920 = vrot.lane.b32.xlu0 %v1808_v63, %s1509_s15 }
 0x3ab   : > { %922 = vrot.lane.b32.xlu1 %v909_v3, %s1509_s15 }
 0x3ae   : > { %930 = vrot.lane.b32.xlu0 %v1808_v63, %s1511_s17 }
 0x3af   : > { %932 = vrot.lane.b32.xlu1 %v909_v3, %s1511_s17 }
 0x3b2   : > { %940 = vrot.lane.b32.xlu0 %v1808_v63, %s1508_s14 }
 0x3b3   : > { %942 = vrot.lane.b32.xlu1 %v909_v3, %s1508_s14  ;;  %s440_s14 = scalar_lea.vmem %s1935_s13, %s1429_s23 }
 0x3b6   : > { %952 = vrot.lane.b32.xlu0 %v1808_v63, %s1512_s18 }
 0x3b7   : > { %954 = vrot.lane.b32.xlu1 %v909_v3, %s1512_s18 }
 0x3ba   : > { %962 = vrot.lane.b32.xlu0 %v1808_v63, %s1514_s20 }
 0x3bb   : > { %964 = vrot.lane.b32.xlu1 %v909_v3, %s1514_s20 }
 0x3be   : > { %972 = vrot.lane.b32.xlu0 %v1808_v63, %s1513_s19 }
 0x3bf   : > { %974 = vrot.lane.b32.xlu1 %v909_v3, %s1513_s19 }
 0x3c2   : > { %982 = vrot.lane.b32.xlu0 %v1808_v63, %s1515_s21 }
 0x3c3   : > { %984 = vrot.lane.b32.xlu1 %v909_v3, %s1515_s21 }
 0x3c6   : > { %1024 = vperm.xlu0 %1477, %v1021_v4  }
 0x418   : > { %v911_v7 = vpop.permute.xlu0 %910 }
 0x419   : > { %v913_v10 = vpop.permute.xlu1 %912 }
 0x41a   : > { %v914_v11 = vsel %vm456_vm1, %v911_v7, %v913_v10  ;;  %v915_v12 = vsel %vm456_vm1, %v913_v10, %v911_v7 }
 0x41b   : > { %v916_v23 = vmul.f32 %v915_v12, %v1681_v21  ;;  %v917_v24 = vmul.f32 %v914_v11, %v1684_v22  ;;  %v992_v12 = vld [vmem:[%s1927_s5] sm:$0xf] }
 0x41c   : > { %v921_v17 = vpop.permute.xlu0 %920 }
 0x41d   : > { %v923_v18 = vpop.permute.xlu1 %922 }
 0x41e   : > { %v924_v19 = vsel %vm475_vm2, %v921_v17, %v923_v18  ;;  %v925_v20 = vsel %vm475_vm2, %v923_v18, %v921_v17 }
 0x41f   : > { %v926_v27 = vmul.f32 %v925_v20, %v1689_v25  ;;  %v927_v28 = vmul.f32 %v924_v19, %v1692_v26 }
 0x420   : > { %v931_v29 = vpop.permute.xlu0 %930 }
 0x421   : > { %v1011_v30 = vpack.c.bf16 %v926_v27, %v916_v23  ;;  %v933_v8 = vpop.permute.xlu1 %932  ;;  %v1012_v9 = vpack.c.bf16 %v927_v28, %v917_v24 }
 0x422   : > { %v934_v31 = vsel %vm500_vm3, %v931_v29, %v933_v8  ;;  %v935_v36 = vsel %vm500_vm3, %v933_v8, %v931_v29  ;;  %v1283_v8 = vpack.c.bf16 %v1603_v0, %v1603_v0  ;;  %v1282_v0 = vld [vmem:[%s1931_s9] sm:$0xf] }
 0x423   : > { %1038 = vmatprep.subr.bf16.mxu1 %v1012_v9  ;;  %v936_v26 = vmul.f32 %v935_v36, %v1697_v32  ;;  %v937_v38 = vmul.f32 %v934_v31, %v1700_v33 }
 0x424   : > { %1039 = vmatpush1.bf16.msra.mxu1 %v1011_v30  ;;  %v941_v37 = vpop.permute.xlu0 %940  ;;  %v1284_v30 = vpack.c.bf16 %v1612_v1, %v1612_v1  ;;  %v1296_v31 = vsel %vm657_vm8, %v1283_v8, 0 }
 0x425   : > { %v943_v21 = vpop.permute.xlu1 %942 }
 0x426   : > { %v944_v22 = vsel %vm519_vm0, %v941_v37, %v943_v21  ;;  %v945_v25 = vsel %vm519_vm0, %v943_v21, %v941_v37  ;;  %v1260_v21 = vld [vmem:[%s1930_s8] sm:$0xff] }
 0x427   : > { %v946_v39 = vmul.f32 %v945_v25, %v1667_v13  ;;  %v947_v40 = vmul.f32 %v944_v22, %v1670_v14 }
 0x428   : > { %v953_v41 = vpop.permute.xlu0 %952 }
 0x429   : > { %v1013_v42 = vpack.c.bf16 %v946_v39, %v936_v26  ;;  %v955_v43 = vpop.permute.xlu1 %954  ;;  %v1014_v44 = vpack.c.bf16 %v947_v40, %v937_v38  ;;  %v1252_v40 = vld [vmem:[%s1929_s7] sm:$0xff] }
 0x42a   : > { %v956_v45 = vsel %vm546_vm4, %v953_v41, %v955_v43  ;;  %v957_v46 = vsel %vm546_vm4, %v955_v43, %v953_v41  ;;  %v1285_v41 = vld [vmem:[%s1932_s10] sm:$0xff] }
 0x42b   : > { %v958_v47 = vmul.f32 %v956_v45, %v1723_v51  ;;  %v959_v32 = vmul.f32 %v957_v46, %v1726_v52  ;;  %1040 = vmatprep.subr.bf16.mxu1 %v1014_v44 }
 0x42c   : > { %1041 = vmatpush1.bf16.msra.mxu1 %v1013_v42  ;;  %v963_v33 = vpop.permute.xlu0 %962 }
 0x42d   : > { %v1015_v13 = vpack.c.bf16 %v958_v47, %v1808_v63  ;;  %v965_v14 = vpop.permute.xlu1 %964  ;;  %v1016_v48 = vpack.c.bf16 %v959_v32, %v909_v3 }
 0x42e   : > { %v966_v49 = vsel %vm571_vm6, %v963_v33, %v965_v14  ;;  %v967_v50 = vsel %vm571_vm6, %v965_v14, %v963_v33 }
 0x42f   : > { %1042 = vmatprep.subr.bf16.mxu1 %v1016_v48  ;;  %v968_v55 = vmul.f32 %v966_v49, %v1750_v5  ;;  %v969_v58 = vmul.f32 %v967_v50, %v1753_v15 }
 0x430   : > { %1043 = vmatpush1.bf16.msra.mxu1 %v1015_v13  ;;  %v973_v53 = vpop.permute.xlu0 %972 }
 0x431   : > { %v975_v54 = vpop.permute.xlu1 %974 }
 0x432   : > { %v976_v51 = vsel %vm590_vm5, %v973_v53, %v975_v54  ;;  %v977_v52 = vsel %vm590_vm5, %v975_v54, %v973_v53 }
 0x433   : > { %v978_v59 = vmul.f32 %v976_v51, %v1734_v57  ;;  %v979_v61 = vmul.f32 %v977_v52, %v1739_v60 }
 0x434   : > { %v983_v62 = vpop.permute.xlu0 %982 }
 0x435   : > { %v1017_v63 = vpack.c.bf16 %v978_v59, %v968_v55  ;;  %v985_v3 = vpop.permute.xlu1 %984  ;;  %v1018_v4 = vpack.c.bf16 %v979_v61, %v969_v58 }
 0x436   : > { %v986_v7 = vsel %vm615_vm7, %v983_v62, %v985_v3  ;;  %v987_v10 = vsel %vm615_vm7, %v985_v3, %v983_v62 }
 0x437   : > { %v988_v11 = vmul.f32 %v1765_v34, %v986_v7  ;;  %v989_v5 = vmul.f32 %v1770_v35, %v987_v10  ;;  %1044 = vmatprep.subr.bf16.mxu1 %v1018_v4 }
 0x438   : > { %1045 = vmatpush1.bf16.msra.mxu1 %v1017_v63 }
 0x439   : > { %v1019_v57 = vpack.c.bf16 %v988_v11, %v988_v11  ;;  %v1020_v15 = vpack.c.bf16 %v989_v5, %v989_v5 }
 0x43b   : > { %1418 = vmatprep.subr.msk.bf16.mxu1 %vm1031_vm12, %v1020_v15  ;;  %v1033_v60 = vsel %vm1031_vm12, %v1019_v57, 0 }
 0x43c   : > { %1047 = vmatpush1.bf16.msra.mxu1 %v1033_v60 }
 0x43f   : > { %1419 = vmatmul.mubr.msk.bf16.vlgmr.msra.gmra.mrb[4].mxu1 %vm1027_vm13, %v992_v12 }
 0x445   : > { %v1025_v6 = vpop.permute.xlu0 %1024 }
 0x512   : > { %v1072_v17 = vpop.f32.mrb[4].mxu1 }
 0x513   : > { %v1073_v18 = vadd.f32 %v1072_v17, %v1025_v6  ;;  %v1074_v34 = vpop.f32.mrb[5].mxu1 }
 0x514   : > { %v1075_v19 = vadd.f32 %v1074_v34, %v1025_v6  ;;  %v1076_v35 = vpop.f32.mrb[6].mxu1 }
 0x515   : > { %v1077_v20 = vpop.f32.mrb[7].mxu1  ;;  %v1082_v23 = vmul.f32 %v1073_v18, %v1073_v18 }
 0x516   : > { %v1079_v24 = vadd.f32 %v1075_v19, %v1073_v18  ;;  %v1083_v27 = vmul.f32 %v1075_v19, %v1075_v19 }
 0x518   : > { %1080 = vadd.xlane.f32.xlu1 %v1079_v24  ;;  %v1084_v28 = vadd.f32 %v1083_v27, %v1082_v23 }
 0x51a   : > { %1085 = vadd.xlane.f32.xlu0 %v1084_v28 }
 0x5a5   : > { %v1081_v29 = vpop.xlane.xlu1 %1080 }
 0x5a6   : > { %1449 = vmatpush3.msra.mxu0 %v1081_v29 }
 0x5a7   : > { %v1086_v9 = vpop.xlane.xlu0 %1085  ;;  %1451 = vmatmul.mubr.msk.f32.vlgmr.msra.gmra.mrb[4].mxu0 %vm714_vm11, %v1792_v16  ;;  %1453 = vmatprep.subr.mxu0 %v1517_v56 }
 0x5a8   : > { %1454 = vmatpush3.msra.mxu0 %v1086_v9  ;;  %1455 = vmatprep.mubr.msk.f32.mxu0 %vm1518_vm10, %v1517_v56 }
 0x5a9   : > { %1424 = vmatprep.subr.msk.bf16.mxu0 %vm657_vm8, %v1284_v30 }
 0x5ab   : > { %1456 = vmatmul.mubr.msk.f32.vlgmr.msra.gmra.mrb[6].mxu0 %vm714_vm11, %v1792_v16 }
 0x5ac   : > { %1302 = vmatpush1.bf16.msra.mxu0 %v1296_v31  ;;  %1333 = vmatprep.mubr.bf16.mxu0 %v1516_v2 }
 0x5af   : > { %1425 = vmatmul.mubr.msk.bf16.vlgmr.msra.gmra.mrb[8].mxu0 %vm1291_vm14, %v1282_v0 }
 0x67a   : > { %v1157_v1 = vpop.f32.mrb[4].mxu0 }
 0x67b   : > { %v1231_v36 = vmul.f32 0.001953125, %v1157_v1  ;;  %v1452_v37 = vpop.f32.mrb[5].mxu0 }
 0x67d   : > { %1238 = vperm.xlu0 %1477, %v1231_v36   ;;  %v1233_v22 = vmul.f32 %v1231_v36, %v1231_v36 }
 0x67e   : > { %v1227_v56 = vpop.f32.mrb[6].mxu0 }
 0x67f   : > { %v1232_v16 = vmul.f32 0.001953125, %v1227_v56  ;;  %v1457_v25 = vpop.f32.mrb[7].mxu0 }
 0x681   : > { %v1234_v26 = vsub.f32 %v1232_v16, %v1233_v22  ;;  %1263 = vperm.xlu0 %1477, %v1260_v21  }
 0x682   : > { %v1335_v42 = vpop.f32.mrb[8].mxu0 }
 0x683   : > { %v1235_v2 = vmax.f32 %v1234_v26, 0.0  ;;  %v1337_v43 = vpop.f32.mrb[9].mxu0 }
 0x684   : > { %v1339_v44 = vpop.f32.mrb[10].mxu0 }
 0x685   : > { %v1243_v38 = vadd.f32 1e-05, %v1235_v2  ;;  %v1340_v45 = vpop.f32.mrb[11].mxu0 }
 0x687   : > { %1490 = vrsqrt.f32 %v1243_v38 }
 0x691   : > { %v1491_v39 = vpop.eup %1490 }
 0x692   : > { %1247 = vperm.xlu1 %1478, %v1491_v39  }
 0x696   : > { %1255 = vperm.xlu1 %1478, %v1252_v40  }
 0x69a   : > { %1288 = vperm.xlu1 %1478, %v1285_v41  }
 0x6fc   : > { %v1239_v46 = vpop.permute.xlu0 %1238 }
 0x6fd   : > { %v1241_v32 = vsub.f32 %v1073_v18, %v1239_v46  ;;  %v1242_v33 = vsub.f32 %v1075_v19, %v1239_v46 }
 0x700   : > { %v1264_v53 = vpop.permute.xlu0 %1263 }
 0x711   : > { %v1248_v47 = vpop.permute.xlu1 %1247 }
 0x712   : > { %v1250_v13 = vmul.f32 %v1248_v47, %v1241_v32  ;;  %v1251_v14 = vmul.f32 %v1248_v47, %v1242_v33 }
 0x715   : > { %v1256_v48 = vpop.permute.xlu1 %1255 }
 0x716   : > { %v1258_v49 = vmul.f32 %v1256_v48, %v1250_v13  ;;  %v1259_v50 = vmul.f32 %v1256_v48, %v1251_v14 }
 0x718   : > { %v1266_v54 = vadd.f32 %v1264_v53, %v1258_v49  ;;  %v1267_v51 = vadd.f32 %v1264_v53, %v1259_v50 }
 0x719   : > { %v1289_v63 = vpop.permute.xlu1 %1288 }
 0x71a   : > { %v1422_v52 = vmul.f32 -1.442695, %v1266_v54  ;;  %v1423_v55 = vmul.f32 -1.442695, %v1267_v51  ;;  %v1336_v10 = vadd.f32 %v1335_v42, %v1289_v63  ;;  %v1338_v5 = vadd.f32 %v1337_v43, %v1289_v63 }
 0x71c   : > { %1492 = vpow2.f32 %v1422_v52 }
 0x71d   : > { %1494 = vpow2.f32 %v1423_v55 }
 0x726   : > { %v1493_v58 = vpop.eup %1492 }
 0x727   : > { %v1495_v59 = vpop.eup %1494  ;;  %v1274_v61 = vadd.f32 1.0, %v1493_v58 }
 0x728   : > { %v1275_v62 = vadd.f32 1.0, %v1495_v59 }
 0x729   : > { %1496 = vrcp.f32 %v1274_v61 }
 0x72a   : > { %1498 = vrcp.f32 %v1275_v62 }
 0x733   : > { %v1497_v3 = vpop.eup %1496 }
 0x734   : > { %v1499_v4 = vpop.eup %1498  ;;  %v1280_v7 = vmul.f32 %v1497_v3, %v1266_v54 }
 0x735   : > { %v1281_v11 = vmul.f32 %v1499_v4, %v1267_v51 }
 0x736   : > { %v1342_v57 = vadd.f32 %v1336_v10, %v1280_v7 }
 0x737   : > { %v1343_v15 = vadd.f32 %v1338_v5, %v1281_v11 }
 0x738   : > { %1344 = vst [vmem:[%s440_s14] sm:$0xff] %v1342_v57 }
 0x739   : > { %1345 = vst [vmem:[%s440_s14 + $0x8] sm:$0xff] %v1343_v15 }
 0x73a PF: > { %s23_s25 = sadd.s32 1, %s1506_s25  }
 0x73b   : > { %p20_p4 = scmp.ge.s32.totalorder %s23_s25, 4  }
 0x73d   :  { %22 = sbr.rel (!%p20_p4) target bundleno = 1 (0x1), region = 102 }

</bundles_post_ra>
